<compile_context>
chip_gen: v7x
topology: tpu7x:2x2x1
jax: 0.10.0
libtpu: 0.0.40
codegen_flags: <defaults>
</compile_context>

<pallas_src>
import functools

import jax
import jax.numpy as jnp
from jax.experimental import pallas as pl
from jax.experimental.pallas import tpu as pltpu

OUTPUT_DIM = 115

# Layer widths exactly as the PyTorch __init__ computes them (Python round()).
D0 = OUTPUT_DIM
D1 = round(OUTPUT_DIM * 0.75)   # 86
D2 = round(OUTPUT_DIM * 0.5)    # 58
D3 = round(OUTPUT_DIM * 0.33)   # 38
D4 = round(OUTPUT_DIM * 0.25)   # 29

# (in, out) for each of the 8 Linear layers, enc then dec.
LAYER_DIMS = [
    (D0, D1), (D1, D2), (D2, D3), (D3, D4),   # encoder
    (D4, D3), (D3, D2), (D2, D1), (D1, D0),   # decoder
]
# Tanh follows every layer except the encoder bottleneck (idx 3) and the final
# decoder layer (idx 7).
NO_TANH = (3, 7)
NUM_LAYERS = len(LAYER_DIMS)

DP = 128                       # lane-padded feature width (all dims <= 115 < 128)
DEFAULT_TB = 2048              # default batch tile (sweepable; 4096 also fits VMEM)
COMPUTE_DTYPE = jnp.bfloat16   # MXU-native streaming dtype; accumulation is f32


def _round_up(n, m):
    return ((n + m - 1) // m) * m


def _pick_tile(batch, block_batch):
    """Batch tile: multiple of 8 (f32 sublane), capped at block_batch, and split
    into >=2 grid steps once batch >= 32 so both v7x TensorCores get work."""
    tb = min(block_batch, _round_up(batch, 8))
    if batch >= 32 and pl.cdiv(batch, tb) < 2:
        tb = _round_up(pl.cdiv(batch, 2), 8)
    return tb


def autoencoder_kernel(x_ref, w_ref, b_ref, out_ref):
    """One batch tile through all 8 Linear(+Tanh) layers, fully fused in VMEM.

    x_ref  : (TB, 115)      f32   -- streamed per grid step (ragged last block ok)
    w_ref  : (8, 128, 128)  bf16  -- zero-padded, VMEM-resident across the grid
    b_ref  : (8, 1, 128)    f32   -- zero-padded, VMEM-resident across the grid
    out_ref: (TB, 115)      f32   -- direct (masked) store of the valid lanes
    """
    x = x_ref[...]                                             # (TB, 115) f32
    # Lane-pad 115 -> 128 in-kernel (padded lanes hit zero weight rows -> exact).
    pad = jnp.zeros((x.shape[0], DP - D0), x.dtype)
    h = jnp.concatenate([x, pad], axis=-1).astype(COMPUTE_DTYPE)   # (TB, 128) bf16

    for i in range(NUM_LAYERS):                                # unrolled, 8 MXU passes
        acc = jnp.dot(h, w_ref[i], preferred_element_type=jnp.float32) + b_ref[i]
        if i == NUM_LAYERS - 1:
            # Final layer (no tanh): store only the 115 valid lanes, f32.
            out_ref[...] = acc[:, :D0].astype(out_ref.dtype)
        elif i in NO_TANH:
            h = acc.astype(COMPUTE_DTYPE)                      # bottleneck, no tanh
        else:
            # bf16 tanh: value feeds the next MXU pass in bf16 anyway; halves EUP
            # occupancy on v6e/v7x (v5e lowers via f32 internally, MXU-bound there).
            h = jnp.tanh(acc.astype(COMPUTE_DTYPE))


@functools.partial(jax.jit, static_argnames=("block_batch",))
def autoencoder_forward(x, w_packed, b_packed, *, block_batch=DEFAULT_TB):
    """x: (batch, 115) f32 -> (batch, 115) f32."""
    batch = x.shape[0]
    x = x.astype(jnp.float32)
    tb = _pick_tile(batch, block_batch)
    grid = (pl.cdiv(batch, tb),)

    # Advisory cost estimate so XLA schedules/overlaps the custom call sensibly.
    flops = 2 * batch * NUM_LAYERS * DP * DP        # padded MXU passes
    transcendentals = batch * sum(
        dout for i, (_, dout) in enumerate(LAYER_DIMS) if i not in NO_TANH)
    bytes_accessed = (
        batch * D0 * 4 * 2                          # x in + out, both f32
        + w_packed.size * w_packed.dtype.itemsize
        + b_packed.size * b_packed.dtype.itemsize)

    return pl.pallas_call(
        autoencoder_kernel,
        out_shape=jax.ShapeDtypeStruct((batch, D0), jnp.float32),
        grid_spec=pltpu.PrefetchScalarGridSpec(
            num_scalar_prefetch=0,
            grid=grid,
            in_specs=[
                # streamed batch tile; last dim == full array dim (115) is legal
                pl.BlockSpec((tb, D0), lambda i: (i, 0)),
                # parameters: constant index_map -> stay VMEM-resident across grid
                # (default buffering kept; ~0.5 MiB total, ample VMEM headroom)
                pl.BlockSpec((NUM_LAYERS, DP, DP), lambda i: (0, 0, 0)),
                pl.BlockSpec((NUM_LAYERS, 1, DP), lambda i: (0, 0, 0)),
            ],
            out_specs=pl.BlockSpec((tb, D0), lambda i: (i, 0)),
        ),
        compiler_params=pltpu.CompilerParams(
            dimension_semantics=("parallel",),      # batch axis; shards across v7x TCs
            vmem_limit_bytes=32 * 1024 * 1024,      # safe on v5e/v6e/v7x
        ),
        cost_estimate=pl.CostEstimate(
            flops=flops,
            transcendentals=transcendentals,
            bytes_accessed=bytes_accessed,
        ),
    )(x, w_packed, b_packed)


def init_params(key):
    """Deterministic init mirroring PyTorch Linear's U(-1/sqrt(fan_in), 1/sqrt(fan_in))."""
    weights, biases = [], []
    for (fan_in, fan_out) in LAYER_DIMS:
        key, kw, kb = jax.random.split(key, 3)
        bound = 1.0 / (fan_in ** 0.5)
        # stored as (in, out) = transpose of PyTorch's (out, in)
        w = jax.random.uniform(kw, (fan_in, fan_out), jnp.float32, -bound, bound)
        b = jax.random.uniform(kb, (fan_out,), jnp.float32, -bound, bound)
        weights.append(w)
        biases.append(b)
    return weights, biases


def pack_params(weights, biases):
    """Zero-pad every layer to 128x128 and stack -> 2 operands instead of 16."""
    w_packed = jnp.zeros((NUM_LAYERS, DP, DP), COMPUTE_DTYPE)
    b_packed = jnp.zeros((NUM_LAYERS, 1, DP), jnp.float32)
    for i, (din, dout) in enumerate(LAYER_DIMS):
        w_packed = w_packed.at[i, :din, :dout].set(weights[i].astype(COMPUTE_DTYPE))
        b_packed = b_packed.at[i, 0, :dout].set(biases[i])
    return w_packed, b_packed


def reference_forward(x, weights, biases):
    """Pure-JAX reference emulating the kernel's bf16 operand rounding and bf16
    tanh (f32 accumulation), so the comparison isolates kernel correctness."""
    def _bf(a):
        return a.astype(COMPUTE_DTYPE).astype(jnp.float32)

    h = _bf(x)
    for i in range(NUM_LAYERS):
        acc = h @ _bf(weights[i]) + biases[i][None, :]
        if i == NUM_LAYERS - 1:
            h = acc
        elif i in NO_TANH:
            h = _bf(acc)
        else:
            h = _bf(jnp.tanh(_bf(acc)))
    return h


if __name__ == "__main__":
    key = jax.random.PRNGKey(0)
    key, kx1, kx2 = jax.random.split(key, 3)

    weights, biases = init_params(key)
    w_packed, b_packed = pack_params(weights, biases)

    # Case 1: small batch, single grid step.
    batch1 = 16
    x1 = jax.random.normal(kx1, (batch1, D0), jnp.float32)
    out1 = jax.block_until_ready(autoencoder_forward(x1, w_packed, b_packed))
    ref1 = reference_forward(x1, weights, biases)
    assert out1.shape == (batch1, D0), out1.shape
    assert jnp.allclose(out1, ref1, atol=5e-2, rtol=5e-2), \
        float(jnp.max(jnp.abs(out1 - ref1)))

    # Case 2: ragged multi-step grid (batch=200, tile=64 -> grid of 4, last block
    # partial), exercising the pipelined batch axis, resident weights, and the
    # masked ragged/lane stores.
    batch2 = 200
    x2 = jax.random.normal(kx2, (batch2, D0), jnp.float32)
    out2 = jax.block_until_ready(
        autoencoder_forward(x2, w_packed, b_packed, block_batch=64))
    ref2 = reference_forward(x2, weights, biases)
    assert out2.shape == (batch2, D0), out2.shape
    assert jnp.allclose(out2, ref2, atol=5e-2, rtol=5e-2), \
        float(jnp.max(jnp.abs(out2 - ref2)))

    print("KERNEL_OK")
</pallas_src>

<mosaic_0001>
module attributes {stable_mosaic.version = 11 : i64} {
  func.func @autoencoder_kernel(%arg0: i32, %arg1: memref<16x115xf32, #tpu.memory_space<vmem>>, %arg2: memref<8x128x128xbf16, #tpu.memory_space<vmem>>, %arg3: memref<8x1x128xf32, #tpu.memory_space<vmem>>, %arg4: memref<16x115xf32, #tpu.memory_space<vmem>>) attributes {dimension_semantics = [#tpu.dimension_semantics<parallel>], iteration_bounds = array<i64: 1>, scalar_prefetch = 0 : i64, scratch_operands = 0 : i64, tpu.core_type = #tpu.core_type<tc>, window_params = [{transform_indices = @transform_0, window_bounds = array<i64: 16, 115>}, {pipeline_mode = #tpu.pipeline_mode<synchronous>, transform_indices = @transform_1, window_bounds = array<i64: 8, 128, 128>}, {pipeline_mode = #tpu.pipeline_mode<synchronous>, transform_indices = @transform_2, window_bounds = array<i64: 8, 1, 128>}, {transform_indices = @transform_3, window_bounds = array<i64: 16, 115>}]} {
    %c0 = arith.constant 0 : index
    %c0_0 = arith.constant 0 : index
    %0 = vector.load %arg1[%c0, %c0_0] : memref<16x115xf32, #tpu.memory_space<vmem>>, vector<16x115xf32>
    %cst = arith.constant 0.000000e+00 : f32
    %1 = vector.broadcast %cst : f32 to vector<16x13xf32>
    %2 = tpu.concatenate %0, %1 in 1 : vector<16x115xf32>, vector<16x13xf32> -> vector<16x128xf32>
    %3 = arith.truncf %2 : vector<16x128xf32> to vector<16x128xbf16>
    %c0_1 = arith.constant 0 : index
    %c0_2 = arith.constant 0 : index
    %c0_3 = arith.constant 0 : index
    %4 = vector.load %arg2[%c0_1, %c0_2, %c0_3] : memref<8x128x128xbf16, #tpu.memory_space<vmem>>, vector<1x128x128xbf16>
    %5 = vector.shape_cast %4 : vector<1x128x128xbf16> to vector<128x128xbf16>
    %cst_4 = arith.constant dense<0.000000e+00> : vector<16x128xf32>
    %6 = tpu.matmul %3, %5, %cst_4 {dimension_numbers = #tpu.dot_dimension_numbers<[1], [0], [0], [1], [0, 0, 1, 1], [], []>} : vector<16x128xbf16>, vector<128x128xbf16>, vector<16x128xf32> -> vector<16x128xf32>
    %c0_5 = arith.constant 0 : index
    %c0_6 = arith.constant 0 : index
    %c0_7 = arith.constant 0 : index
    %7 = vector.load %arg3[%c0_5, %c0_6, %c0_7] : memref<8x1x128xf32, #tpu.memory_space<vmem>>, vector<1x1x128xf32>
    %8 = vector.shape_cast %7 : vector<1x1x128xf32> to vector<1x128xf32>
    %9 = vector.broadcast %8 : vector<1x128xf32> to vector<16x128xf32>
    %10 = arith.addf %6, %9 : vector<16x128xf32>
    %11 = arith.truncf %10 : vector<16x128xf32> to vector<16x128xbf16>
    %12 = math.tanh %11 : vector<16x128xbf16>
    %c1 = arith.constant 1 : index
    %c0_8 = arith.constant 0 : index
    %c0_9 = arith.constant 0 : index
    %13 = vector.load %arg2[%c1, %c0_8, %c0_9] : memref<8x128x128xbf16, #tpu.memory_space<vmem>>, vector<1x128x128xbf16>
    %14 = vector.shape_cast %13 : vector<1x128x128xbf16> to vector<128x128xbf16>
    %cst_10 = arith.constant dense<0.000000e+00> : vector<16x128xf32>
    %15 = tpu.matmul %12, %14, %cst_10 {dimension_numbers = #tpu.dot_dimension_numbers<[1], [0], [0], [1], [0, 0, 1, 1], [], []>} : vector<16x128xbf16>, vector<128x128xbf16>, vector<16x128xf32> -> vector<16x128xf32>
    %c1_11 = arith.constant 1 : index
    %c0_12 = arith.constant 0 : index
    %c0_13 = arith.constant 0 : index
    %16 = vector.load %arg3[%c1_11, %c0_12, %c0_13] : memref<8x1x128xf32, #tpu.memory_space<vmem>>, vector<1x1x128xf32>
    %17 = vector.shape_cast %16 : vector<1x1x128xf32> to vector<1x128xf32>
    %18 = vector.broadcast %17 : vector<1x128xf32> to vector<16x128xf32>
    %19 = arith.addf %15, %18 : vector<16x128xf32>
    %20 = arith.truncf %19 : vector<16x128xf32> to vector<16x128xbf16>
    %21 = math.tanh %20 : vector<16x128xbf16>
    %c2 = arith.constant 2 : index
    %c0_14 = arith.constant 0 : index
    %c0_15 = arith.constant 0 : index
    %22 = vector.load %arg2[%c2, %c0_14, %c0_15] : memref<8x128x128xbf16, #tpu.memory_space<vmem>>, vector<1x128x128xbf16>
    %23 = vector.shape_cast %22 : vector<1x128x128xbf16> to vector<128x128xbf16>
    %cst_16 = arith.constant dense<0.000000e+00> : vector<16x128xf32>
    %24 = tpu.matmul %21, %23, %cst_16 {dimension_numbers = #tpu.dot_dimension_numbers<[1], [0], [0], [1], [0, 0, 1, 1], [], []>} : vector<16x128xbf16>, vector<128x128xbf16>, vector<16x128xf32> -> vector<16x128xf32>
    %c2_17 = arith.constant 2 : index
    %c0_18 = arith.constant 0 : index
    %c0_19 = arith.constant 0 : index
    %25 = vector.load %arg3[%c2_17, %c0_18, %c0_19] : memref<8x1x128xf32, #tpu.memory_space<vmem>>, vector<1x1x128xf32>
    %26 = vector.shape_cast %25 : vector<1x1x128xf32> to vector<1x128xf32>
    %27 = vector.broadcast %26 : vector<1x128xf32> to vector<16x128xf32>
    %28 = arith.addf %24, %27 : vector<16x128xf32>
    %29 = arith.truncf %28 : vector<16x128xf32> to vector<16x128xbf16>
    %30 = math.tanh %29 : vector<16x128xbf16>
    %c3 = arith.constant 3 : index
    %c0_20 = arith.constant 0 : index
    %c0_21 = arith.constant 0 : index
    %31 = vector.load %arg2[%c3, %c0_20, %c0_21] : memref<8x128x128xbf16, #tpu.memory_space<vmem>>, vector<1x128x128xbf16>
    %32 = vector.shape_cast %31 : vector<1x128x128xbf16> to vector<128x128xbf16>
    %cst_22 = arith.constant dense<0.000000e+00> : vector<16x128xf32>
    %33 = tpu.matmul %30, %32, %cst_22 {dimension_numbers = #tpu.dot_dimension_numbers<[1], [0], [0], [1], [0, 0, 1, 1], [], []>} : vector<16x128xbf16>, vector<128x128xbf16>, vector<16x128xf32> -> vector<16x128xf32>
    %c3_23 = arith.constant 3 : index
    %c0_24 = arith.constant 0 : index
    %c0_25 = arith.constant 0 : index
    %34 = vector.load %arg3[%c3_23, %c0_24, %c0_25] : memref<8x1x128xf32, #tpu.memory_space<vmem>>, vector<1x1x128xf32>
    %35 = vector.shape_cast %34 : vector<1x1x128xf32> to vector<1x128xf32>
    %36 = vector.broadcast %35 : vector<1x128xf32> to vector<16x128xf32>
    %37 = arith.addf %33, %36 : vector<16x128xf32>
    %38 = arith.truncf %37 : vector<16x128xf32> to vector<16x128xbf16>
    %c4 = arith.constant 4 : index
    %c0_26 = arith.constant 0 : index
    %c0_27 = arith.constant 0 : index
    %39 = vector.load %arg2[%c4, %c0_26, %c0_27] : memref<8x128x128xbf16, #tpu.memory_space<vmem>>, vector<1x128x128xbf16>
    %40 = vector.shape_cast %39 : vector<1x128x128xbf16> to vector<128x128xbf16>
    %cst_28 = arith.constant dense<0.000000e+00> : vector<16x128xf32>
    %41 = tpu.matmul %38, %40, %cst_28 {dimension_numbers = #tpu.dot_dimension_numbers<[1], [0], [0], [1], [0, 0, 1, 1], [], []>} : vector<16x128xbf16>, vector<128x128xbf16>, vector<16x128xf32> -> vector<16x128xf32>
    %c4_29 = arith.constant 4 : index
    %c0_30 = arith.constant 0 : index
    %c0_31 = arith.constant 0 : index
    %42 = vector.load %arg3[%c4_29, %c0_30, %c0_31] : memref<8x1x128xf32, #tpu.memory_space<vmem>>, vector<1x1x128xf32>
    %43 = vector.shape_cast %42 : vector<1x1x128xf32> to vector<1x128xf32>
    %44 = vector.broadcast %43 : vector<1x128xf32> to vector<16x128xf32>
    %45 = arith.addf %41, %44 : vector<16x128xf32>
    %46 = arith.truncf %45 : vector<16x128xf32> to vector<16x128xbf16>
    %47 = math.tanh %46 : vector<16x128xbf16>
    %c5 = arith.constant 5 : index
    %c0_32 = arith.constant 0 : index
    %c0_33 = arith.constant 0 : index
    %48 = vector.load %arg2[%c5, %c0_32, %c0_33] : memref<8x128x128xbf16, #tpu.memory_space<vmem>>, vector<1x128x128xbf16>
    %49 = vector.shape_cast %48 : vector<1x128x128xbf16> to vector<128x128xbf16>
    %cst_34 = arith.constant dense<0.000000e+00> : vector<16x128xf32>
    %50 = tpu.matmul %47, %49, %cst_34 {dimension_numbers = #tpu.dot_dimension_numbers<[1], [0], [0], [1], [0, 0, 1, 1], [], []>} : vector<16x128xbf16>, vector<128x128xbf16>, vector<16x128xf32> -> vector<16x128xf32>
    %c5_35 = arith.constant 5 : index
    %c0_36 = arith.constant 0 : index
    %c0_37 = arith.constant 0 : index
    %51 = vector.load %arg3[%c5_35, %c0_36, %c0_37] : memref<8x1x128xf32, #tpu.memory_space<vmem>>, vector<1x1x128xf32>
    %52 = vector.shape_cast %51 : vector<1x1x128xf32> to vector<1x128xf32>
    %53 = vector.broadcast %52 : vector<1x128xf32> to vector<16x128xf32>
    %54 = arith.addf %50, %53 : vector<16x128xf32>
    %55 = arith.truncf %54 : vector<16x128xf32> to vector<16x128xbf16>
    %56 = math.tanh %55 : vector<16x128xbf16>
    %c6 = arith.constant 6 : index
    %c0_38 = arith.constant 0 : index
    %c0_39 = arith.constant 0 : index
    %57 = vector.load %arg2[%c6, %c0_38, %c0_39] : memref<8x128x128xbf16, #tpu.memory_space<vmem>>, vector<1x128x128xbf16>
    %58 = vector.shape_cast %57 : vector<1x128x128xbf16> to vector<128x128xbf16>
    %cst_40 = arith.constant dense<0.000000e+00> : vector<16x128xf32>
    %59 = tpu.matmul %56, %58, %cst_40 {dimension_numbers = #tpu.dot_dimension_numbers<[1], [0], [0], [1], [0, 0, 1, 1], [], []>} : vector<16x128xbf16>, vector<128x128xbf16>, vector<16x128xf32> -> vector<16x128xf32>
    %c6_41 = arith.constant 6 : index
    %c0_42 = arith.constant 0 : index
    %c0_43 = arith.constant 0 : index
    %60 = vector.load %arg3[%c6_41, %c0_42, %c0_43] : memref<8x1x128xf32, #tpu.memory_space<vmem>>, vector<1x1x128xf32>
    %61 = vector.shape_cast %60 : vector<1x1x128xf32> to vector<1x128xf32>
    %62 = vector.broadcast %61 : vector<1x128xf32> to vector<16x128xf32>
    %63 = arith.addf %59, %62 : vector<16x128xf32>
    %64 = arith.truncf %63 : vector<16x128xf32> to vector<16x128xbf16>
    %65 = math.tanh %64 : vector<16x128xbf16>
    %c7 = arith.constant 7 : index
    %c0_44 = arith.constant 0 : index
    %c0_45 = arith.constant 0 : index
    %66 = vector.load %arg2[%c7, %c0_44, %c0_45] : memref<8x128x128xbf16, #tpu.memory_space<vmem>>, vector<1x128x128xbf16>
    %67 = vector.shape_cast %66 : vector<1x128x128xbf16> to vector<128x128xbf16>
    %cst_46 = arith.constant dense<0.000000e+00> : vector<16x128xf32>
    %68 = tpu.matmul %65, %67, %cst_46 {dimension_numbers = #tpu.dot_dimension_numbers<[1], [0], [0], [1], [0, 0, 1, 1], [], []>} : vector<16x128xbf16>, vector<128x128xbf16>, vector<16x128xf32> -> vector<16x128xf32>
    %c7_47 = arith.constant 7 : index
    %c0_48 = arith.constant 0 : index
    %c0_49 = arith.constant 0 : index
    %69 = vector.load %arg3[%c7_47, %c0_48, %c0_49] : memref<8x1x128xf32, #tpu.memory_space<vmem>>, vector<1x1x128xf32>
    %70 = vector.shape_cast %69 : vector<1x1x128xf32> to vector<1x128xf32>
    %71 = vector.broadcast %70 : vector<1x128xf32> to vector<16x128xf32>
    %72 = arith.addf %68, %71 : vector<16x128xf32>
    %73 = vector.extract_strided_slice %72 {offsets = [0, 0], sizes = [16, 115], strides = [1, 1]} : vector<16x128xf32> to vector<16x115xf32>
    %c0_50 = arith.constant 0 : index
    %c0_51 = arith.constant 0 : index
    %74 = vector.load %arg4[%c0_50, %c0_51] : memref<16x115xf32, #tpu.memory_space<vmem>>, vector<16x115xf32>
    tpu.vector_store %arg4[%c0_50, %c0_51], %73 {strides = array<i32>} : memref<16x115xf32, #tpu.memory_space<vmem>>, vector<16x115xf32>,
    return
  }
  func.func @transform_0(%arg0: i32) -> (i32, i32) {
    %c0_i32 = arith.constant 0 : i32
    %c0_i32_0 = arith.constant 0 : i32
    return %arg0, %c0_i32 : i32, i32
  }
  func.func @transform_1(%arg0: i32) -> (i32, i32, i32) {
    %c0_i32 = arith.constant 0 : i32
    %c0_i32_0 = arith.constant 0 : i32
    %c0_i32_1 = arith.constant 0 : i32
    %c0_i32_2 = arith.constant 0 : i32
    return %c0_i32, %c0_i32_0, %c0_i32_1 : i32, i32, i32
  }
  func.func @transform_2(%arg0: i32) -> (i32, i32, i32) {
    %c0_i32 = arith.constant 0 : i32
    %c0_i32_0 = arith.constant 0 : i32
    %c0_i32_1 = arith.constant 0 : i32
    %c0_i32_2 = arith.constant 0 : i32
    return %c0_i32, %c0_i32_0, %c0_i32_1 : i32, i32, i32
  }
  func.func @transform_3(%arg0: i32) -> (i32, i32) {
    %c0_i32 = arith.constant 0 : i32
    %c0_i32_0 = arith.constant 0 : i32
    return %arg0, %c0_i32 : i32, i32
  }
}

</mosaic_0001>

<bundles_post_ra>
// kernel: autoencoder_forward.1
= control target key start
LH: loop header
LB: loop body
LE: loop exit
PB: predicated region body
PF: predicated region fallthrough
CT: control target
= control target key end

     0   :  { %8 = vsyncpa [#allocation3], 0  ;;  %s1665_s0 = inlined_call_operand.hbm [shape: f32[16,115], index: 0, kind: input, shape index: {}]   ;;  %s1666_s1 = inlined_call_operand.hbm [shape: bf16[8,128,128], index: 1, kind: input, shape index: {}]   ;;  %s1667_s2 = inlined_call_operand.hbm [shape: f32[8,1,128], index: 2, kind: input, shape index: {}]   ;;  %s1668_s3 = inlined_call_operand.hbm [shape: f32[16,115], index: 3, kind: output, shape index: {}]  }
   0x1   :  { %9 = vsyncpa [#allocation6], 0 }
   0x2   :  { %10 = vsyncpa [#allocation4], 0  ;;  %s1495_s12 = smov [#allocation5]   ;;  %s1401_s16 = scalar_lea.hbm %s1666_s1, 8192 }
   0x3   :  { %s28_s13 = sshll.u32 %s1495_s12, 4  ;;  %p1402_p0 = scmp.ne.s32.totalorder %s1666_s1, %s1401_s16  ;;  %s29_s13 = int_to_ptr.vmem [resolvable:$true] %s28_s13 }
   0x4   :  { %p1405_p1 = scmp.lt.u32.totalorder %s1401_s16, %s1666_s1 }
   0x6   :  { %p1407_p2 = pnand %p1405_p1, %p1402_p0 }
   0x8   :  { %1410 = shalt.err (!%p1407_p2)
}
   0x9   :  { %s1411_s21 = scalar_lea.vmem %s29_s13, 8192  ;;  %p1416_p4 = scmp.lt.s32.totalorder %s29_s13, %s29_s13 }
   0xa   :  { %p1412_p3 = scmp.ne.s32.totalorder %s29_s13, %s1411_s21  ;;  %p1417_p5 = scmp.lt.s32.totalorder %s1411_s21, %s1411_s21 }
   0xc   :  { %p1418_p6 = por %p1417_p5, %p1416_p4 }
   0xe   :  { %p1419_p7 = pnand %p1418_p6, %p1412_p3 }
  0x10   :  { %1422 = shalt.err (!%p1419_p7)
}
  0x11   :  { %s1496_s22 = smov 64   ;;  %s1497_s23 = smov 4  }
  0x12   :  { %34 = dma.hbm_to_vmem [thread:$0]  %s1666_s1, 8192, %s29_s13, [#allocation6], %s1496_s22, %s1496_s22, %s1497_s23  }
  0x13   :  { %s1498_s26 = smov [#allocation2]   ;;  %s1423_s30 = scalar_lea.hbm %s1665_s0, 256 }
  0x14   :  { %s16_s27 = sshll.u32 %s1498_s26, 4  ;;  %p1424_p8 = scmp.ne.s32.totalorder %s1665_s0, %s1423_s30  ;;  %s17_s27 = int_to_ptr.vmem [resolvable:$true] %s16_s27 }
  0x15   :  { %p1427_p9 = scmp.lt.u32.totalorder %s1423_s30, %s1665_s0 }
  0x17   :  { %p1429_p10 = pnand %p1427_p9, %p1424_p8 }
  0x19   :  { %1432 = shalt.err (!%p1429_p10)
}
  0x1a   :  { %s1433_s8 = scalar_lea.vmem %s17_s27, 256  ;;  %p1438_p12 = scmp.lt.s32.totalorder %s17_s27, %s17_s27 }
  0x1b   :  { %p1434_p11 = scmp.ne.s32.totalorder %s17_s27, %s1433_s8  ;;  %p1439_p13 = scmp.lt.s32.totalorder %s1433_s8, %s1433_s8 }
  0x1d   :  { %p1440_p0 = por %p1439_p13, %p1438_p12 }
  0x1f   :  { %p1441_p1 = pnand %p1440_p0, %p1434_p11 }
  0x21   :  { %1444 = shalt.err (!%p1441_p1)
}
  0x22   :  { %s1499_s1 = smov 128   ;;  %s1500_s9 = smov 8  }
  0x23   :  { %22 = dma.hbm_to_vmem [thread:$0]  %s1665_s0, 256, %s17_s27, [#allocation3], %s1499_s1, %s1499_s1, %s1500_s9  }
  0x24   :  { %s1501_s12 = smov [#allocation7]   ;;  %s1445_s16 = scalar_lea.hbm %s1667_s2, 128 }
  0x25   :  { %s40_s13 = sshll.u32 %s1501_s12, 4  ;;  %p1446_p2 = scmp.ne.s32.totalorder %s1667_s2, %s1445_s16  ;;  %s41_s13 = int_to_ptr.vmem [resolvable:$true] %s40_s13 }
  0x26   :  { %p1449_p3 = scmp.lt.u32.totalorder %s1445_s16, %s1667_s2 }
  0x28   :  { %p1451_p4 = pnand %p1449_p3, %p1446_p2 }
  0x2a   :  { %1454 = shalt.err (!%p1451_p4)
}
  0x2b   :  { %s1455_s21 = scalar_lea.vmem %s41_s13, 128  ;;  %p1460_p6 = scmp.lt.s32.totalorder %s41_s13, %s41_s13 }
  0x2c   :  { %p1456_p5 = scmp.ne.s32.totalorder %s41_s13, %s1455_s21  ;;  %p1461_p7 = scmp.lt.s32.totalorder %s1455_s21, %s1455_s21 }
  0x2e   :  { %p1462_p8 = por %p1461_p7, %p1460_p6 }
  0x30   :  { %p1463_p9 = pnand %p1462_p8, %p1456_p5 }
  0x32   :  { %1466 = shalt.err (!%p1463_p9)
}
  0x33   :  { %s1502_s0 = smov 16   ;;  %s1503_s22 = smov 1  }
  0x34   :  { %46 = dma.hbm_to_vmem [thread:$0]  %s1667_s2, 128, %s41_s13, [#allocation6], %s1502_s0, %s1502_s0, %s1503_s22  }
  0x35   :  { %1489 = dma.done.wait [#allocation3], 256  }
  0x36   :  { %1490 = vsyncadd [#allocation3], 4294967040 }
  0x37   :  { %1491 = dma.done.wait [#allocation6], 8320  }
  0x38   :  { %1492 = vsyncadd [#allocation6], 4294958976  ;;  %v1504_v0 = vmov 0.0   ;;  %vm1505_vm0 = vmmov 0   ;;  %v1325_v1 = vld [vmem:[#allocation5] sm:$0xff]   ;;  %v1326_v2 = vld [vmem:[#allocation5 + $0x8] sm:$0xff]  }
  0x39   :  { %1153 = vmatprep.subr.bf16.mxu0 %v1504_v0  ;;  %1169 = vmatprep.mubr.msk.bf16.mxu0 %vm1505_vm0, %v1504_v0  ;;  %v1327_v3 = vld [vmem:[#allocation5 + $0x10] sm:$0xff]   ;;  %v1333_v4 = vld [vmem:[#allocation5 + $0x40] sm:$0xff]   ;;  %v1328_v5 = vld [vmem:[#allocation5 + $0x18] sm:$0xff]   ;;  %vm59_vm1 = vcmask 941056   ;;  %s1506_s2 = smov [#allocation8]  }
  0x3a   :  { %1173 = vmatprep.subr.bf16.mxu1 %v1504_v0  ;;  %1189 = vmatprep.mubr.msk.bf16.mxu1 %vm1505_vm0, %v1504_v0  ;;  %v1334_v6 = vld [vmem:[#allocation5 + $0x48] sm:$0xff]   ;;  %v1329_v7 = vld [vmem:[#allocation5 + $0x20] sm:$0xff]   ;;  %v1335_v8 = vld [vmem:[#allocation5 + $0x50] sm:$0xff]   ;;  %s993_s25 = sshll.u32 %s1506_s2, 4  ;;  %s994_s25 = int_to_ptr.vmem [resolvable:$true] %s993_s25 }
  0x3b   :  { %1154 = vmatpush3.bf16.msra.mxu0 %v1325_v1  ;;  %1174 = vmatpush3.bf16.msra.mxu1 %v1333_v4  ;;  %v1330_v9 = vld [vmem:[#allocation5 + $0x28] sm:$0xff]   ;;  %v1331_v10 = vld [vmem:[#allocation5 + $0x30] sm:$0xff]   ;;  %vm1015_vm2 = vmpackc.low %vm59_vm1, %vm59_vm1  ;;  %s1467_s26 = scalar_lea.vmem %s994_s25, 256  ;;  %p1472_p11 = scmp.lt.s32.totalorder %s994_s25, %s994_s25 }
  0x3c   :  { %1155 = vmatprep.subr.bf16.mxu0 %v1504_v0  ;;  %1175 = vmatprep.subr.bf16.mxu1 %v1504_v0  ;;  %v1332_v11 = vld [vmem:[#allocation5 + $0x38] sm:$0xff]   ;;  %v57_v12 = vld [vmem:[#allocation2] sm:$0xff]  ;;  %v1337_v16 = vld [vmem:[#allocation5 + $0x60] sm:$0xff]   ;;  %p1468_p10 = scmp.ne.s32.totalorder %s994_s25, %s1467_s26  ;;  %p1473_p12 = scmp.lt.s32.totalorder %s1467_s26, %s1467_s26 }
  0x3d   :  { %v58_v13 = vld [vmem:[#allocation2 + $0x8] sm:$0xff]  ;;  %v1338_v17 = vld [vmem:[#allocation5 + $0x68] sm:$0xff]   ;;  %v1339_v18 = vld [vmem:[#allocation5 + $0x70] sm:$0xff]  }
  0x3e   :  { %v1016_v14 = vpack.c.bf16 %v58_v13, %v57_v12  ;;  %v1336_v15 = vld [vmem:[#allocation5 + $0x58] sm:$0xff]   ;;  %v1341_v20 = vld [vmem:[#allocation5 + $0x80] sm:$0xff]   ;;  %v1342_v21 = vld [vmem:[#allocation5 + $0x88] sm:$0xff]   ;;  %p1474_p13 = por %p1473_p12, %p1472_p11 }
  0x3f   :  { %1156 = vmatpush3.bf16.msra.mxu0 %v1326_v2  ;;  %1176 = vmatpush3.bf16.msra.mxu1 %v1334_v6  ;;  %v1340_v19 = vld [vmem:[#allocation5 + $0x78] sm:$0xff]   ;;  %v1343_v22 = vld [vmem:[#allocation5 + $0x90] sm:$0xff]   ;;  %v1006_v23 = vld [vmem:[#allocation7] ss:$0 sm:$0xff] }
  0x40   :  { %1157 = vmatprep.subr.bf16.mxu0 %v1504_v0  ;;  %1177 = vmatprep.subr.bf16.mxu1 %v1504_v0  ;;  %v1344_v32 = vld [vmem:[#allocation5 + $0x98] sm:$0xff]   ;;  %v1345_v33 = vld [vmem:[#allocation5 + $0xa0] sm:$0xff]   ;;  %v1346_v34 = vld [vmem:[#allocation5 + $0xa8] sm:$0xff]   ;;  %p1475_p0 = pnand %p1474_p13, %p1468_p10 }
  0x41   :  { %v1347_v35 = vld [vmem:[#allocation5 + $0xb0] sm:$0xff]   ;;  %v1348_v36 = vld [vmem:[#allocation5 + $0xb8] sm:$0xff]   ;;  %v1349_v37 = vld [vmem:[#allocation5 + $0xc0] sm:$0xff]  }
  0x42   :  { %v1350_v38 = vld [vmem:[#allocation5 + $0xc8] sm:$0xff]   ;;  %v1351_v39 = vld [vmem:[#allocation5 + $0xd0] sm:$0xff]   ;;  %v1018_v40 = vld [vmem:[#allocation7 + $0x1] ss:$0 sm:$0xff] }
  0x43   :  { %1158 = vmatpush3.bf16.msra.mxu0 %v1327_v3  ;;  %1178 = vmatpush3.bf16.msra.mxu1 %v1335_v8  ;;  %v1352_v49 = vld [vmem:[#allocation5 + $0xd8] sm:$0xff]   ;;  %v1353_v50 = vld [vmem:[#allocation5 + $0xe0] sm:$0xff]   ;;  %v1354_v51 = vld [vmem:[#allocation5 + $0xe8] sm:$0xff]  }
  0x44   :  { %1159 = vmatprep.subr.bf16.mxu0 %v1504_v0  ;;  %1179 = vmatprep.subr.bf16.mxu1 %v1504_v0  ;;  %v1355_v52 = vld [vmem:[#allocation5 + $0xf0] sm:$0xff]   ;;  %v1356_v53 = vld [vmem:[#allocation5 + $0xf8] sm:$0xff]   ;;  %v1357_v54 = vld [vmem:[#allocation5 + $0x100] sm:$0xff]  }
  0x45   :  { %v1358_v55 = vld [vmem:[#allocation5 + $0x108] sm:$0xff]   ;;  %v1359_v56 = vld [vmem:[#allocation5 + $0x110] sm:$0xff]   ;;  %v1360_v57 = vld [vmem:[#allocation5 + $0x118] sm:$0xff]  }
  0x46   :  { %v1361_v58 = vld [vmem:[#allocation5 + $0x120] sm:$0xff]   ;;  %v1362_v59 = vld [vmem:[#allocation5 + $0x128] sm:$0xff]   ;;  %v1363_v6 = vld [vmem:[#allocation5 + $0x130] sm:$0xff]  }
  0x47   :  { %1160 = vmatpush3.bf16.msra.mxu0 %v1328_v5  ;;  %1180 = vmatpush3.bf16.msra.mxu1 %v1336_v15  ;;  %v1027_v60 = vld [vmem:[#allocation7 + $0x2] ss:$0 sm:$0xff] }
  0x48   :  { %1161 = vmatprep.subr.bf16.mxu0 %v1504_v0  ;;  %1181 = vmatprep.subr.bf16.mxu1 %v1504_v0  ;;  %v1365_v8 = vld [vmem:[#allocation5 + $0x140] sm:$0xff]  }
  0x4b   :  { %1162 = vmatpush3.bf16.msra.mxu0 %v1329_v7  ;;  %1182 = vmatpush3.bf16.msra.mxu1 %v1337_v16  ;;  %v1364_v7 = vld [vmem:[#allocation5 + $0x138] sm:$0xff]  }
  0x4c   :  { %1163 = vmatprep.subr.bf16.mxu0 %v1504_v0  ;;  %1183 = vmatprep.subr.bf16.mxu1 %v1504_v0 }
  0x4f   :  { %1164 = vmatpush3.bf16.msra.mxu0 %v1330_v9  ;;  %1184 = vmatpush3.bf16.msra.mxu1 %v1338_v17  ;;  %v1366_v9 = vld [vmem:[#allocation5 + $0x148] sm:$0xff]  }
  0x50   :  { %1165 = vmatprep.subr.bf16.mxu0 %v1504_v0  ;;  %1185 = vmatprep.subr.bf16.mxu1 %v1504_v0 }
  0x53   :  { %1166 = vmatpush3.bf16.msra.mxu0 %v1331_v10  ;;  %1186 = vmatpush3.bf16.msra.mxu1 %v1339_v18  ;;  %v1367_v10 = vld [vmem:[#allocation5 + $0x150] sm:$0xff]  }
  0x54   :  { %1167 = vmatprep.subr.bf16.mxu0 %v1504_v0  ;;  %1187 = vmatprep.subr.bf16.mxu1 %v1504_v0 }
  0x57   :  { %1168 = vmatpush3.bf16.msra.mxu0 %v1332_v11  ;;  %1188 = vmatpush3.bf16.msra.mxu1 %v1340_v19  ;;  %v1036_v11 = vld [vmem:[#allocation7 + $0x3] ss:$0 sm:$0xff]  ;;  %v1368_v19 = vld [vmem:[#allocation5 + $0x158] sm:$0xff]  }
  0x58   :  { %1193 = vmatprep.subr.bf16.mxu0 %v1504_v0  ;;  %1213 = vmatprep.subr.bf16.mxu1 %v1504_v0 }
  0x5a   :  { %1170 = vmatmul.mubr.msk.bf16.vlgmr.msra.gmra.mrb[0].mxu0 %vm1015_vm2, %v1016_v14 }
  0x5b   :  { %1209 = vmatprep.mubr.msk.bf16.mxu0 %vm1505_vm0, %v1504_v0  ;;  %1194 = vmatpush3.bf16.msra.mxu0 %v1341_v20  ;;  %v1369_v20 = vld [vmem:[#allocation5 + $0x160] sm:$0xff]  }
  0x5c   :  { %1195 = vmatprep.subr.bf16.mxu0 %v1504_v0 }
  0x5f   :  { %1196 = vmatpush3.bf16.msra.mxu0 %v1342_v21  ;;  %v1370_v21 = vld [vmem:[#allocation5 + $0x168] sm:$0xff]  }
  0x60   :  { %1197 = vmatprep.subr.bf16.mxu0 %v1504_v0 }
  0x63   :  { %1198 = vmatpush3.bf16.msra.mxu0 %v1343_v22  ;;  %v1371_v22 = vld [vmem:[#allocation5 + $0x170] sm:$0xff]  }
  0x64   :  { %1199 = vmatprep.subr.bf16.mxu0 %v1504_v0 }
  0x67   :  { %1200 = vmatpush3.bf16.msra.mxu0 %v1344_v32 }
  0x68   :  { %1201 = vmatprep.subr.bf16.mxu0 %v1504_v0 }
  0x6b   :  { %1202 = vmatpush3.bf16.msra.mxu0 %v1345_v33 }
  0x6c   :  { %1203 = vmatprep.subr.bf16.mxu0 %v1504_v0 }
  0x6f   :  { %1204 = vmatpush3.bf16.msra.mxu0 %v1346_v34 }
  0x70   :  { %1205 = vmatprep.subr.bf16.mxu0 %v1504_v0 }
  0x73   :  { %1206 = vmatpush3.bf16.msra.mxu0 %v1347_v35 }
  0x74   :  { %1207 = vmatprep.subr.bf16.mxu0 %v1504_v0 }
  0x77   :  { %1208 = vmatpush3.bf16.msra.mxu0 %v1348_v36  ;;  %v1376_v36 = vld [vmem:[#allocation5 + $0x198] sm:$0xff]  }
  0x78   :  { %1233 = vmatprep.subr.bf16.mxu0 %v1504_v0 }
 0x12d   :  { %v168_v24 = vpop.f32.mrb[0].mxu0 }
 0x12e   :  { %v1171_v25 = vpop.f32.mrb[1].mxu0  ;;  %v169_v27 = vadd.f32 %v1006_v23, %v168_v24  ;;  %v1373_v24 = vld [vmem:[#allocation5 + $0x180] sm:$0xff]  }
 0x12f   :  { %v171_v26 = vpop.f32.mrb[2].mxu0  ;;  %v1374_v25 = vld [vmem:[#allocation5 + $0x188] sm:$0xff]  }
 0x130   :  { %v172_v28 = vadd.f32 %v1006_v23, %v171_v26  ;;  %v1172_v29 = vpop.f32.mrb[3].mxu0  ;;  %v1372_v23 = vld [vmem:[#allocation5 + $0x178] sm:$0xff]   ;;  %v1375_v26 = vld [vmem:[#allocation5 + $0x190] sm:$0xff]  }
 0x132   :  { %v175_v30 = vpack.c.bf16 %v172_v28, %v169_v27  ;;  %v1045_v27 = vld [vmem:[#allocation7 + $0x4] ss:$0 sm:$0xff] }
 0x134   :  { %1389 = vtanh.bf16 %v175_v30 }
 0x13f   :  { %v1390_v31 = vpop.eup %1389 }
 0x140   :  { %1190 = vmatmul.mubr.bf16.vlgmr.msra.gmra.mrb[0].mxu1 %v1390_v31 }
 0x141   :  { %1229 = vmatprep.mubr.msk.bf16.mxu1 %vm1505_vm0, %v1504_v0  ;;  %1214 = vmatpush3.bf16.msra.mxu1 %v1349_v37  ;;  %v1377_v37 = vld [vmem:[#allocation5 + $0x1a0] sm:$0xff]  }
 0x142   :  { %1215 = vmatprep.subr.bf16.mxu1 %v1504_v0 }
 0x145   :  { %1216 = vmatpush3.bf16.msra.mxu1 %v1350_v38  ;;  %v1378_v38 = vld [vmem:[#allocation5 + $0x1a8] sm:$0xff]  }
 0x146   :  { %1217 = vmatprep.subr.bf16.mxu1 %v1504_v0 }
 0x149   :  { %1218 = vmatpush3.bf16.msra.mxu1 %v1351_v39  ;;  %v1379_v39 = vld [vmem:[#allocation5 + $0x1b0] sm:$0xff]  }
 0x14a   :  { %1219 = vmatprep.subr.bf16.mxu1 %v1504_v0 }
 0x14d   :  { %1220 = vmatpush3.bf16.msra.mxu1 %v1352_v49 }
 0x14e   :  { %1221 = vmatprep.subr.bf16.mxu1 %v1504_v0 }
 0x151   :  { %1222 = vmatpush3.bf16.msra.mxu1 %v1353_v50 }
 0x152   :  { %1223 = vmatprep.subr.bf16.mxu1 %v1504_v0 }
 0x155   :  { %1224 = vmatpush3.bf16.msra.mxu1 %v1354_v51 }
 0x156   :  { %1225 = vmatprep.subr.bf16.mxu1 %v1504_v0 }
 0x159   :  { %1226 = vmatpush3.bf16.msra.mxu1 %v1355_v52 }
 0x15a   :  { %1227 = vmatprep.subr.bf16.mxu1 %v1504_v0 }
 0x15d   :  { %1228 = vmatpush3.bf16.msra.mxu1 %v1356_v53  ;;  %v1384_v53 = vld [vmem:[#allocation5 + $0x1d8] sm:$0xff]  }
 0x15e   :  { %1253 = vmatprep.subr.bf16.mxu1 %v1504_v0 }
 0x213   :  { %v284_v41 = vpop.f32.mrb[0].mxu1 }
 0x214   :  { %v1191_v42 = vpop.f32.mrb[1].mxu1  ;;  %v285_v44 = vadd.f32 %v1018_v40, %v284_v41  ;;  %v1381_v41 = vld [vmem:[#allocation5 + $0x1c0] sm:$0xff]  }
 0x215   :  { %v287_v43 = vpop.f32.mrb[2].mxu1  ;;  %v1382_v42 = vld [vmem:[#allocation5 + $0x1c8] sm:$0xff]  }
 0x216   :  { %v288_v45 = vadd.f32 %v1018_v40, %v287_v43  ;;  %v1192_v46 = vpop.f32.mrb[3].mxu1  ;;  %v1380_v40 = vld [vmem:[#allocation5 + $0x1b8] sm:$0xff]   ;;  %v1383_v43 = vld [vmem:[#allocation5 + $0x1d0] sm:$0xff]  }
 0x218   :  { %v291_v47 = vpack.c.bf16 %v288_v45, %v285_v44  ;;  %v1054_v44 = vld [vmem:[#allocation7 + $0x5] ss:$0 sm:$0xff] }
 0x21a   :  { %1391 = vtanh.bf16 %v291_v47 }
 0x225   :  { %v1392_v48 = vpop.eup %1391 }
 0x226   :  { %1210 = vmatmul.mubr.bf16.vlgmr.msra.gmra.mrb[4].mxu0 %v1392_v48 }
 0x227   :  { %1249 = vmatprep.mubr.msk.bf16.mxu0 %vm1505_vm0, %v1504_v0  ;;  %1234 = vmatpush3.bf16.msra.mxu0 %v1357_v54  ;;  %v1385_v54 = vld [vmem:[#allocation5 + $0x1e0] sm:$0xff]  }
 0x228   :  { %1235 = vmatprep.subr.bf16.mxu0 %v1504_v0 }
 0x22b   :  { %1236 = vmatpush3.bf16.msra.mxu0 %v1358_v55  ;;  %v1386_v55 = vld [vmem:[#allocation5 + $0x1e8] sm:$0xff]  }
 0x22c   :  { %1237 = vmatprep.subr.bf16.mxu0 %v1504_v0 }
 0x22f   :  { %1238 = vmatpush3.bf16.msra.mxu0 %v1359_v56  ;;  %v1387_v56 = vld [vmem:[#allocation5 + $0x1f0] sm:$0xff]  }
 0x230   :  { %1239 = vmatprep.subr.bf16.mxu0 %v1504_v0 }
 0x233   :  { %1240 = vmatpush3.bf16.msra.mxu0 %v1360_v57  ;;  %v1388_v57 = vld [vmem:[#allocation5 + $0x1f8] sm:$0xff]  }
 0x234   :  { %1241 = vmatprep.subr.bf16.mxu0 %v1504_v0 }
 0x237   :  { %1242 = vmatpush3.bf16.msra.mxu0 %v1361_v58  ;;  %v1063_v58 = vld [vmem:[#allocation7 + $0x6] ss:$0 sm:$0xff] }
 0x238   :  { %1243 = vmatprep.subr.bf16.mxu0 %v1504_v0 }
 0x23b   :  { %1244 = vmatpush3.bf16.msra.mxu0 %v1362_v59 }
 0x23c   :  { %1245 = vmatprep.subr.bf16.mxu0 %v1504_v0 }
 0x23f   :  { %1246 = vmatpush3.bf16.msra.mxu0 %v1363_v6 }
 0x240   :  { %1247 = vmatprep.subr.bf16.mxu0 %v1504_v0 }
 0x243   :  { %1248 = vmatpush3.bf16.msra.mxu0 %v1364_v7 }
 0x244   :  { %1273 = vmatprep.subr.bf16.mxu0 %v1504_v0 }
 0x2f9   :  { %v400_v61 = vpop.f32.mrb[4].mxu0 }
 0x2fa   :  { %v1211_v62 = vpop.f32.mrb[5].mxu0  ;;  %v401_v1 = vadd.f32 %v1027_v60, %v400_v61 }
 0x2fb   :  { %v403_v63 = vpop.f32.mrb[6].mxu0 }
 0x2fc   :  { %v404_v2 = vadd.f32 %v1027_v60, %v403_v63  ;;  %v1212_v3 = vpop.f32.mrb[7].mxu0 }
 0x2fe   :  { %v407_v4 = vpack.c.bf16 %v404_v2, %v401_v1 }
 0x300   :  { %1393 = vtanh.bf16 %v407_v4  ;;  %v1072_v4 = vld [vmem:[#allocation7 + $0x7] ss:$0 sm:$0xff] }
 0x30b   :  { %v1394_v5 = vpop.eup %1393 }
 0x30c   :  { %1230 = vmatmul.mubr.bf16.vlgmr.msra.gmra.mrb[4].mxu1 %v1394_v5 }
 0x30d   :  { %1269 = vmatprep.mubr.msk.bf16.mxu1 %vm1505_vm0, %v1504_v0  ;;  %1254 = vmatpush3.bf16.msra.mxu1 %v1365_v8 }
 0x30e   :  { %1255 = vmatprep.subr.bf16.mxu1 %v1504_v0 }
 0x311   :  { %1256 = vmatpush3.bf16.msra.mxu1 %v1366_v9 }
 0x312   :  { %1257 = vmatprep.subr.bf16.mxu1 %v1504_v0 }
 0x315   :  { %1258 = vmatpush3.bf16.msra.mxu1 %v1367_v10 }
 0x316   :  { %1259 = vmatprep.subr.bf16.mxu1 %v1504_v0 }
 0x319   :  { %1260 = vmatpush3.bf16.msra.mxu1 %v1368_v19 }
 0x31a   :  { %1261 = vmatprep.subr.bf16.mxu1 %v1504_v0 }
 0x31d   :  { %1262 = vmatpush3.bf16.msra.mxu1 %v1369_v20 }
 0x31e   :  { %1263 = vmatprep.subr.bf16.mxu1 %v1504_v0 }
 0x321   :  { %1264 = vmatpush3.bf16.msra.mxu1 %v1370_v21 }
 0x322   :  { %1265 = vmatprep.subr.bf16.mxu1 %v1504_v0 }
 0x325   :  { %1266 = vmatpush3.bf16.msra.mxu1 %v1371_v22 }
 0x326   :  { %1267 = vmatprep.subr.bf16.mxu1 %v1504_v0 }
 0x329   :  { %1268 = vmatpush3.bf16.msra.mxu1 %v1372_v23 }
 0x32a   :  { %1293 = vmatprep.subr.bf16.mxu1 %v1504_v0 }
 0x3df   :  { %v516_v12 = vpop.f32.mrb[4].mxu1 }
 0x3e0   :  { %v1231_v13 = vpop.f32.mrb[5].mxu1  ;;  %v517_v15 = vadd.f32 %v1036_v11, %v516_v12 }
 0x3e1   :  { %v519_v14 = vpop.f32.mrb[6].mxu1 }
 0x3e2   :  { %v520_v16 = vadd.f32 %v1036_v11, %v519_v14  ;;  %v1232_v17 = vpop.f32.mrb[7].mxu1 }
 0x3e4   :  { %v523_v18 = vpack.c.bf16 %v520_v16, %v517_v15 }
 0x3e6   :  { %1250 = vmatmul.mubr.bf16.vlgmr.msra.gmra.mrb[8].mxu0 %v523_v18 }
 0x3e7   :  { %1289 = vmatprep.mubr.msk.bf16.mxu0 %vm1505_vm0, %v1504_v0  ;;  %1274 = vmatpush3.bf16.msra.mxu0 %v1373_v24 }
 0x3e8   :  { %1275 = vmatprep.subr.bf16.mxu0 %v1504_v0 }
 0x3eb   :  { %1276 = vmatpush3.bf16.msra.mxu0 %v1374_v25 }
 0x3ec   :  { %1277 = vmatprep.subr.bf16.mxu0 %v1504_v0 }
 0x3ef   :  { %1278 = vmatpush3.bf16.msra.mxu0 %v1375_v26 }
 0x3f0   :  { %1279 = vmatprep.subr.bf16.mxu0 %v1504_v0 }
 0x3f3   :  { %1280 = vmatpush3.bf16.msra.mxu0 %v1376_v36 }
 0x3f4   :  { %1281 = vmatprep.subr.bf16.mxu0 %v1504_v0 }
 0x3f7   :  { %1282 = vmatpush3.bf16.msra.mxu0 %v1377_v37 }
 0x3f8   :  { %1283 = vmatprep.subr.bf16.mxu0 %v1504_v0 }
 0x3fb   :  { %1284 = vmatpush3.bf16.msra.mxu0 %v1378_v38 }
 0x3fc   :  { %1285 = vmatprep.subr.bf16.mxu0 %v1504_v0 }
 0x3ff   :  { %1286 = vmatpush3.bf16.msra.mxu0 %v1379_v39 }
 0x400   :  { %1287 = vmatprep.subr.bf16.mxu0 %v1504_v0 }
 0x403   :  { %1288 = vmatpush3.bf16.msra.mxu0 %v1380_v40 }
 0x4b9   :  { %v631_v28 = vpop.f32.mrb[8].mxu0 }
 0x4ba   :  { %v1251_v29 = vpop.f32.mrb[9].mxu0  ;;  %v632_v31 = vadd.f32 %v1045_v27, %v631_v28 }
 0x4bb   :  { %v634_v30 = vpop.f32.mrb[10].mxu0 }
 0x4bc   :  { %v635_v32 = vadd.f32 %v1045_v27, %v634_v30  ;;  %v1252_v33 = vpop.f32.mrb[11].mxu0 }
 0x4be   :  { %v638_v34 = vpack.c.bf16 %v635_v32, %v632_v31 }
 0x4c0   :  { %1395 = vtanh.bf16 %v638_v34 }
 0x4cb   :  { %v1396_v35 = vpop.eup %1395 }
 0x4cc   :  { %1270 = vmatmul.mubr.bf16.vlgmr.msra.gmra.mrb[8].mxu1 %v1396_v35 }
 0x4cd   :  { %1309 = vmatprep.mubr.msk.bf16.mxu1 %vm1505_vm0, %v1504_v0  ;;  %1294 = vmatpush3.bf16.msra.mxu1 %v1381_v41 }
 0x4ce   :  { %1295 = vmatprep.subr.bf16.mxu1 %v1504_v0 }
 0x4d1   :  { %1296 = vmatpush3.bf16.msra.mxu1 %v1382_v42 }
 0x4d2   :  { %1297 = vmatprep.subr.bf16.mxu1 %v1504_v0 }
 0x4d5   :  { %1298 = vmatpush3.bf16.msra.mxu1 %v1383_v43 }
 0x4d6   :  { %1299 = vmatprep.subr.bf16.mxu1 %v1504_v0 }
 0x4d9   :  { %1300 = vmatpush3.bf16.msra.mxu1 %v1384_v53 }
 0x4da   :  { %1301 = vmatprep.subr.bf16.mxu1 %v1504_v0 }
 0x4dd   :  { %1302 = vmatpush3.bf16.msra.mxu1 %v1385_v54 }
 0x4de   :  { %1303 = vmatprep.subr.bf16.mxu1 %v1504_v0 }
 0x4e1   :  { %1304 = vmatpush3.bf16.msra.mxu1 %v1386_v55 }
 0x4e2   :  { %1305 = vmatprep.subr.bf16.mxu1 %v1504_v0 }
 0x4e5   :  { %1306 = vmatpush3.bf16.msra.mxu1 %v1387_v56 }
 0x4e6   :  { %1307 = vmatprep.subr.bf16.mxu1 %v1504_v0 }
 0x4e9   :  { %1308 = vmatpush3.bf16.msra.mxu1 %v1388_v57 }
 0x59f   :  { %v747_v45 = vpop.f32.mrb[8].mxu1 }
 0x5a0   :  { %v1271_v46 = vpop.f32.mrb[9].mxu1  ;;  %v748_v48 = vadd.f32 %v1054_v44, %v747_v45 }
 0x5a1   :  { %v750_v47 = vpop.f32.mrb[10].mxu1 }
 0x5a2   :  { %v751_v49 = vadd.f32 %v1054_v44, %v750_v47  ;;  %v1272_v50 = vpop.f32.mrb[11].mxu1 }
 0x5a4   :  { %v754_v51 = vpack.c.bf16 %v751_v49, %v748_v48 }
 0x5a6   :  { %1397 = vtanh.bf16 %v754_v51 }
 0x5b1   :  { %v1398_v52 = vpop.eup %1397 }
 0x5b2   :  { %1290 = vmatmul.mubr.bf16.vlgmr.msra.gmra.mrb[12].mxu0 %v1398_v52 }
 0x685   :  { %v863_v59 = vpop.f32.mrb[12].mxu0 }
 0x686   :  { %v1291_v60 = vpop.f32.mrb[13].mxu0  ;;  %v864_v62 = vadd.f32 %v1063_v58, %v863_v59 }
 0x687   :  { %v866_v61 = vpop.f32.mrb[14].mxu0 }
 0x688   :  { %v867_v63 = vadd.f32 %v1063_v58, %v866_v61  ;;  %v1292_v1 = vpop.f32.mrb[15].mxu0 }
 0x68a   :  { %v870_v2 = vpack.c.bf16 %v867_v63, %v864_v62 }
 0x68c   :  { %1399 = vtanh.bf16 %v870_v2 }
 0x697   :  { %v1400_v3 = vpop.eup %1399 }
 0x698   :  { %1310 = vmatmul.mubr.bf16.vlgmr.msra.gmra.mrb[12].mxu1 %v1400_v3 }
 0x76b   :  { %v979_v5 = vpop.f32.mrb[12].mxu1 }
 0x76c   :  { %v980_v6 = vadd.f32 %v1072_v4, %v979_v5  ;;  %v1311_v7 = vpop.f32.mrb[13].mxu1 }
 0x76d   :  { %v982_v8 = vpop.f32.mrb[14].mxu1 }
 0x76e   :  { %986 = vst.msk [vmem:[#allocation8] sm:$0xff] %vm59_vm1, %v980_v6  ;;  %v983_v0 = vadd.f32 %v1072_v4, %v982_v8  ;;  %v1312_v9 = vpop.f32.mrb[15].mxu1 }
 0x770   :  { %987 = vst.msk [vmem:[#allocation8 + $0x8] sm:$0xff] %vm59_vm1, %v983_v0 }
 0x771   :  { %1478 = shalt.err (!%p1475_p0)
}
 0x772   :  { %s1479_s29 = scalar_lea.hbm %s1668_s3, 256 }
 0x773   :  { %p1480_p1 = scmp.ne.s32.totalorder %s1668_s3, %s1479_s29  ;;  %p1483_p2 = scmp.lt.u32.totalorder %s1479_s29, %s1668_s3 }
 0x775   :  { %p1485_p3 = pnand %p1483_p2, %p1480_p1 }
 0x777   :  { %1488 = shalt.err (!%p1485_p3)
}
 0x778   :  { %999 = dma.vmem_to_hbm [thread:$0]  %s994_s25, 256, %s1668_s3, [#allocation4], %s1499_s1, %s1499_s1, %s1500_s9  }
 0x779   :  { %1493 = dma.done.wait [#allocation4], 256  }
 0x77a   :  { %1494 = vsyncadd [#allocation4], 4294967040 }
 0x77b   :  { %1003 = vsyncpa [#allocation3], 1 }
 0x77c   :  { %1004 = vsyncpa [#allocation6], 1 }
 0x77d   :  { %1005 = vsyncpa [#allocation4], 1 }

</bundles_post_ra>
